<compile_context>
chip_gen: v5e
topology: v5e:2x2
jax: 0.10.0
libtpu: 0.0.40
codegen_flags: <defaults>
</compile_context>

<pallas_src>
import functools

import jax
import jax.numpy as jnp
from jax import lax
from jax.experimental import pallas as pl
from jax.experimental.pallas import tpu as pltpu


def _amsoftmax_kernel(gt_ref, pr_ref, loss_ref, m_sc, l_sc, t_sc, *, s, m):
    c = pl.program_id(1)
    n_c = pl.num_programs(1)

    @pl.when(c == 0)
    def _init():
        m_sc[...] = jnp.full_like(m_sc, -jnp.inf)
        l_sc[...] = jnp.zeros_like(l_sc)
        t_sc[...] = jnp.zeros_like(t_sc)

    gt = gt_ref[...]                                     # (TB, 1) f32 labels
    bias = gt * (-m * s)                                 # per-row shift -m*s*gt
    pr = pr_ref[...].astype(jnp.float32) * s + bias      # (TB, TC) modified logits
    tb, tc = pr.shape

    # Target-class logit: select-and-reduce in the same tile pass (no one-hot).
    tgt = gt.astype(jnp.int32)                           # == gt.long() (trunc toward 0)
    cls_ids = c * tc + lax.broadcasted_iota(jnp.int32, (tb, tc), 1)
    t_sc[...] += jnp.sum(jnp.where(cls_ids == tgt, pr, 0.0),
                         axis=-1, keepdims=True)

    # Online logsumexp across class tiles.
    m_new = jnp.maximum(m_sc[...], jnp.max(pr, axis=-1, keepdims=True))
    alpha = jnp.exp(m_sc[...] - m_new)
    l_sc[...] = alpha * l_sc[...] + jnp.sum(jnp.exp(pr - m_new),
                                            axis=-1, keepdims=True)
    m_sc[...] = m_new

    @pl.when(c == n_c - 1)
    def _finalize():
        lse = m_sc[...] + jnp.log(l_sc[...])
        loss_ref[...] = lse - t_sc[...]                  # per-row NLL (TB, 1)


def _pick_tiles(B, C, itemsize, vmem_budget=16 * 1024 * 1024):
    """Largest legal tiles whose double-buffered logits stay under the budget."""
    tb = next((t for t in (256, 128, 64, 32, 16, 8) if B % t == 0), B)
    tc = next((t for t in (8192, 4096, 2048, 1024, 512, 256, 128)
               if C % t == 0 and 2 * tb * t * itemsize <= vmem_budget), C)
    return tb, tc


def amsoftmax_v1_loss(pr, gt, m=0.35, s=30.0, tb=None, tc=None):
    """pr: (B, C) float logits, gt: (B,) float class labels -> scalar loss."""
    B, C = pr.shape
    auto_tb, auto_tc = _pick_tiles(B, C, jnp.dtype(pr.dtype).itemsize)
    tb = auto_tb if tb is None else tb
    tc = auto_tc if tc is None else tc
    assert B % tb == 0 and C % tc == 0, "tile sizes must divide (B, C)"

    gt_f = gt.astype(jnp.float32).reshape(B, 1)

    kernel = functools.partial(_amsoftmax_kernel, s=float(s), m=float(m))
    grid = (B // tb, C // tc)

    cost = pl.CostEstimate(
        flops=6 * B * C,
        transcendentals=B * C,
        bytes_accessed=B * C * jnp.dtype(pr.dtype).itemsize + 8 * B,
    )

    per_row = pl.pallas_call(
        kernel,
        out_shape=jax.ShapeDtypeStruct((B, 1), jnp.float32),
        grid_spec=pltpu.PrefetchScalarGridSpec(
            num_scalar_prefetch=0,
            grid=grid,
            in_specs=[
                # Label column: block index fixed over c -> DMA'd once per i.
                pl.BlockSpec((tb, 1), lambda i, c: (i, 0)),
                # Logits tile: streamed along the class axis (double-buffered).
                pl.BlockSpec((tb, tc), lambda i, c: (i, c)),
            ],
            out_specs=pl.BlockSpec((tb, 1), lambda i, c: (i, 0)),
            scratch_shapes=[
                pltpu.VMEM((tb, 1), jnp.float32),   # running max
                pltpu.VMEM((tb, 1), jnp.float32),   # running sum
                pltpu.VMEM((tb, 1), jnp.float32),   # target logit accumulator
            ],
        ),
        compiler_params=pltpu.CompilerParams(
            dimension_semantics=("parallel", "arbitrary"),
            vmem_limit_bytes=32 * 1024 * 1024,
        ),
        cost_estimate=cost,
    )(gt_f, pr)

    # Mean over the full batch (outside the kernel; divides by the true B).
    return jnp.mean(per_row)


def _reference_loss(pr, gt, m=0.35, s=30.0):
    """Pure-JAX faithful translation of the PyTorch module."""
    gt2d = gt.reshape(-1, 1).astype(jnp.float32)
    pr_mod = (gt2d * (pr - m) + (1.0 - gt2d) * pr) * s
    labels = gt.astype(jnp.int32)
    logp = jax.nn.log_softmax(pr_mod, axis=-1)
    nll = -jnp.take_along_axis(logp, labels[:, None], axis=-1)[:, 0]
    return jnp.mean(nll)


if __name__ == "__main__":
    key = jax.random.PRNGKey(0)
    k1, k2 = jax.random.split(key)

    # Small shapes, but chosen so the grid is exercised: (B/TB, C/TC) = (2, 3).
    B, C = 16, 384
    pr = jax.random.normal(k1, (B, C), dtype=jnp.float32)
    gt = jax.random.randint(k2, (B,), 0, C).astype(jnp.float32)

    loss = amsoftmax_v1_loss(pr, gt, m=0.35, s=30.0, tb=8, tc=128)
    jax.block_until_ready(loss)

    ref = _reference_loss(pr, gt, m=0.35, s=30.0)
    # s=30 with class-index-sized row shifts -> allow modest f32 tolerance.
    assert jnp.allclose(loss, ref, rtol=1e-3, atol=1e-2), (loss, ref)

    print("KERNEL_OK")
</pallas_src>

<mosaic_0001>
module attributes {stable_mosaic.version = 11 : i64} {
  func.func @_amsoftmax_kernel(%arg0: i32, %arg1: i32, %arg2: memref<8x1xf32, #tpu.memory_space<vmem>>, %arg3: memref<8x128xf32, #tpu.memory_space<vmem>>, %arg4: memref<8x1xf32, #tpu.memory_space<vmem>>, %arg5: memref<8x1xf32, #tpu.memory_space<vmem>>, %arg6: memref<8x1xf32, #tpu.memory_space<vmem>>, %arg7: memref<8x1xf32, #tpu.memory_space<vmem>>) attributes {dimension_semantics = [#tpu.dimension_semantics<parallel>, #tpu.dimension_semantics<arbitrary>], iteration_bounds = array<i64: 2, 3>, scalar_prefetch = 0 : i64, scratch_operands = 3 : i64, tpu.core_type = #tpu.core_type<tc>, window_params = [{transform_indices = @transform_0, window_bounds = array<i64: 8, 1>}, {transform_indices = @transform_1, window_bounds = array<i64: 8, 128>}, {transform_indices = @transform_2, window_bounds = array<i64: 8, 1>}]} {
    %c0_i32 = arith.constant 0 : i32
    %0 = arith.cmpi eq, %arg1, %c0_i32 : i32
    %1 = arith.extui %0 : i1 to i32
    %c0_i32_0 = arith.constant 0 : i32
    %2 = arith.cmpi ne, %1, %c0_i32_0 : i32
    scf.if %2 {
      %cst_24 = arith.constant 0xFF800000 : f32
      %45 = vector.broadcast %cst_24 : f32 to vector<8x1xf32>
      %c0_25 = arith.constant 0 : index
      %c0_26 = arith.constant 0 : index
      %46 = vector.load %arg5[%c0_25, %c0_26] : memref<8x1xf32, #tpu.memory_space<vmem>>, vector<8x1xf32>
      tpu.vector_store %arg5[%c0_25, %c0_26], %45 {strides = array<i32>} : memref<8x1xf32, #tpu.memory_space<vmem>>, vector<8x1xf32>,
      %cst_27 = arith.constant 0.000000e+00 : f32
      %47 = vector.broadcast %cst_27 : f32 to vector<8x1xf32>
      %c0_28 = arith.constant 0 : index
      %c0_29 = arith.constant 0 : index
      %48 = vector.load %arg6[%c0_28, %c0_29] : memref<8x1xf32, #tpu.memory_space<vmem>>, vector<8x1xf32>
      tpu.vector_store %arg6[%c0_28, %c0_29], %47 {strides = array<i32>} : memref<8x1xf32, #tpu.memory_space<vmem>>, vector<8x1xf32>,
      %cst_30 = arith.constant 0.000000e+00 : f32
      %49 = vector.broadcast %cst_30 : f32 to vector<8x1xf32>
      %c0_31 = arith.constant 0 : index
      %c0_32 = arith.constant 0 : index
      %50 = vector.load %arg7[%c0_31, %c0_32] : memref<8x1xf32, #tpu.memory_space<vmem>>, vector<8x1xf32>
      tpu.vector_store %arg7[%c0_31, %c0_32], %49 {strides = array<i32>} : memref<8x1xf32, #tpu.memory_space<vmem>>, vector<8x1xf32>,
    } else {
    }
    %c0 = arith.constant 0 : index
    %c0_1 = arith.constant 0 : index
    %3 = vector.load %arg2[%c0, %c0_1] : memref<8x1xf32, #tpu.memory_space<vmem>>, vector<8x1xf32>
    %cst = arith.constant -1.050000e+01 : f32
    %4 = vector.broadcast %cst : f32 to vector<8x1xf32>
    %5 = arith.mulf %3, %4 : vector<8x1xf32>
    %c0_2 = arith.constant 0 : index
    %c0_3 = arith.constant 0 : index
    %6 = vector.load %arg3[%c0_2, %c0_3] : memref<8x128xf32, #tpu.memory_space<vmem>>, vector<8x128xf32>
    %cst_4 = arith.constant 3.000000e+01 : f32
    %7 = vector.broadcast %cst_4 : f32 to vector<8x128xf32>
    %8 = arith.mulf %6, %7 : vector<8x128xf32>
    %9 = vector.broadcast %5 : vector<8x1xf32> to vector<8x128xf32>
    %10 = arith.addf %8, %9 : vector<8x128xf32>
    %11 = arith.fptosi %3 : vector<8x1xf32> to vector<8x1xi32>
    %c128_i32 = arith.constant 128 : i32
    %12 = arith.muli %arg1, %c128_i32 : i32
    %13 = tpu.iota {dimensions = array<i32: 1>} : vector<8x128xi32>
    %14 = vector.broadcast %12 : i32 to vector<8x128xi32>
    %15 = arith.addi %14, %13 : vector<8x128xi32>
    %c0_5 = arith.constant 0 : index
    %c0_6 = arith.constant 0 : index
    %16 = vector.load %arg7[%c0_5, %c0_6] : memref<8x1xf32, #tpu.memory_space<vmem>>, vector<8x1xf32>
    %17 = vector.broadcast %11 : vector<8x1xi32> to vector<8x128xi32>
    %18 = arith.cmpi eq, %15, %17 : vector<8x128xi32>
    %cst_7 = arith.constant 0.000000e+00 : f32
    %19 = vector.broadcast %cst_7 : f32 to vector<8x128xf32>
    %20 = arith.select %18, %10, %19 : vector<8x128xi1>, vector<8x128xf32>
    %cst_8 = arith.constant dense<0.000000e+00> : vector<8xf32>
    %21 = vector.multi_reduction <add>, %20, %cst_8 [1] : vector<8x128xf32> to vector<8xf32>
    %22 = vector.shape_cast %21 : vector<8xf32> to vector<8x1xf32>
    %23 = arith.addf %16, %22 : vector<8x1xf32>
    %c0_9 = arith.constant 0 : index
    %c0_10 = arith.constant 0 : index
    %24 = vector.load %arg7[%c0_9, %c0_10] : memref<8x1xf32, #tpu.memory_space<vmem>>, vector<8x1xf32>
    tpu.vector_store %arg7[%c0_9, %c0_10], %23 {strides = array<i32>} : memref<8x1xf32, #tpu.memory_space<vmem>>, vector<8x1xf32>,
    %c0_11 = arith.constant 0 : index
    %c0_12 = arith.constant 0 : index
    %25 = vector.load %arg5[%c0_11, %c0_12] : memref<8x1xf32, #tpu.memory_space<vmem>>, vector<8x1xf32>
    %cst_13 = arith.constant dense<0xFF800000> : vector<8xf32>
    %26 = vector.multi_reduction <maximumf>, %10, %cst_13 [1] : vector<8x128xf32> to vector<8xf32>
    %27 = vector.shape_cast %26 : vector<8xf32> to vector<8x1xf32>
    %28 = arith.maximumf %25, %27 : vector<8x1xf32>
    %c0_14 = arith.constant 0 : index
    %c0_15 = arith.constant 0 : index
    %29 = vector.load %arg5[%c0_14, %c0_15] : memref<8x1xf32, #tpu.memory_space<vmem>>, vector<8x1xf32>
    %30 = arith.subf %29, %28 : vector<8x1xf32>
    %31 = math.exp %30 : vector<8x1xf32>
    %c0_16 = arith.constant 0 : index
    %c0_17 = arith.constant 0 : index
    %32 = vector.load %arg6[%c0_16, %c0_17] : memref<8x1xf32, #tpu.memory_space<vmem>>, vector<8x1xf32>
    %33 = arith.mulf %31, %32 : vector<8x1xf32>
    %34 = vector.broadcast %28 : vector<8x1xf32> to vector<8x128xf32>
    %35 = arith.subf %10, %34 : vector<8x128xf32>
    %36 = math.exp %35 : vector<8x128xf32>
    %cst_18 = arith.constant dense<0.000000e+00> : vector<8xf32>
    %37 = vector.multi_reduction <add>, %36, %cst_18 [1] : vector<8x128xf32> to vector<8xf32>
    %38 = vector.shape_cast %37 : vector<8xf32> to vector<8x1xf32>
    %39 = arith.addf %33, %38 : vector<8x1xf32>
    %c0_19 = arith.constant 0 : index
    %c0_20 = arith.constant 0 : index
    %40 = vector.load %arg6[%c0_19, %c0_20] : memref<8x1xf32, #tpu.memory_space<vmem>>, vector<8x1xf32>
    tpu.vector_store %arg6[%c0_19, %c0_20], %39 {strides = array<i32>} : memref<8x1xf32, #tpu.memory_space<vmem>>, vector<8x1xf32>,
    %c0_21 = arith.constant 0 : index
    %c0_22 = arith.constant 0 : index
    %41 = vector.load %arg5[%c0_21, %c0_22] : memref<8x1xf32, #tpu.memory_space<vmem>>, vector<8x1xf32>
    tpu.vector_store %arg5[%c0_21, %c0_22], %28 {strides = array<i32>} : memref<8x1xf32, #tpu.memory_space<vmem>>, vector<8x1xf32>,
    %c2_i32 = arith.constant 2 : i32
    %42 = arith.cmpi eq, %arg1, %c2_i32 : i32
    %43 = arith.extui %42 : i1 to i32
    %c0_i32_23 = arith.constant 0 : i32
    %44 = arith.cmpi ne, %43, %c0_i32_23 : i32
    scf.if %44 {
      %c0_24 = arith.constant 0 : index
      %c0_25 = arith.constant 0 : index
      %45 = vector.load %arg5[%c0_24, %c0_25] : memref<8x1xf32, #tpu.memory_space<vmem>>, vector<8x1xf32>
      %c0_26 = arith.constant 0 : index
      %c0_27 = arith.constant 0 : index
      %46 = vector.load %arg6[%c0_26, %c0_27] : memref<8x1xf32, #tpu.memory_space<vmem>>, vector<8x1xf32>
      %47 = math.log %46 : vector<8x1xf32>
      %48 = arith.addf %45, %47 : vector<8x1xf32>
      %c0_28 = arith.constant 0 : index
      %c0_29 = arith.constant 0 : index
      %49 = vector.load %arg7[%c0_28, %c0_29] : memref<8x1xf32, #tpu.memory_space<vmem>>, vector<8x1xf32>
      %50 = arith.subf %48, %49 : vector<8x1xf32>
      %c0_30 = arith.constant 0 : index
      %c0_31 = arith.constant 0 : index
      %51 = vector.load %arg4[%c0_30, %c0_31] : memref<8x1xf32, #tpu.memory_space<vmem>>, vector<8x1xf32>
      tpu.vector_store %arg4[%c0_30, %c0_31], %50 {strides = array<i32>} : memref<8x1xf32, #tpu.memory_space<vmem>>, vector<8x1xf32>,
    } else {
    }
    return
  }
  func.func @transform_0(%arg0: i32, %arg1: i32) -> (i32, i32) {
    %c0_i32 = arith.constant 0 : i32
    %c0_i32_0 = arith.constant 0 : i32
    return %arg0, %c0_i32 : i32, i32
  }
  func.func @transform_1(%arg0: i32, %arg1: i32) -> (i32, i32) {
    %c0_i32 = arith.constant 0 : i32
    return %arg0, %arg1 : i32, i32
  }
  func.func @transform_2(%arg0: i32, %arg1: i32) -> (i32, i32) {
    %c0_i32 = arith.constant 0 : i32
    %c0_i32_0 = arith.constant 0 : i32
    return %arg0, %c0_i32 : i32, i32
  }
}

</mosaic_0001>

<bundles_post_ra>
// kernel: tpu_custom_call.1
= control target key start
LH: loop header
LB: loop body
LE: loop exit
PB: predicated region body
PF: predicated region fallthrough
CT: control target
= control target key end

     0   :  { %7 = vsyncpa [#allocation6], 0  ;;  %s698_s0 = inlined_call_operand.vmem [shape: f32[16,1], index: 0, kind: input, shape index: {}]   ;;  %s699_s1 = inlined_call_operand.hbm [shape: f32[16,384], index: 1, kind: input, shape index: {}]   ;;  %s700_s2 = inlined_call_operand.vmem [shape: f32[16,1], index: 2, kind: output, shape index: {}]  }
   0x1   :  { %9 = vsyncpa [#allocation6 + $0x1], 0  ;;  %s572_s9 = smov 0   ;;  %s574_s10 = smov 0  }
   0x2   :  { %s576_s11 = smov 0   ;;  %s578_s12 = smov 0  }
   0x3   :  { %s580_s13 = smov 0   ;;  %s582_s14 = smov 0  }
   0x4   :  { %s584_s15 = smov 0   ;;  %s586_s16 = smov 0  }
   0x5 LB: > { %s353_s17 = sadd.s32 4294967295, %s552_s16   ;;  %s24_s18 = sadd.s32 1, %s544_s14  ;;  %s552_s16 = sphi %s586_s16, %s15_s16   ;;  %s548_s15 = sphi %s584_s15, %s709_s15   ;;  %s544_s14 = sphi %s582_s14, %s708_s14   ;;  %s540_s13 = sphi %s580_s13, %s707_s13   ;;  %s536_s12 = sphi %s578_s12, %s706_s12   ;;  %s532_s11 = sphi %s576_s11, %s705_s11   ;;  %s528_s10 = sphi %s574_s10, %s704_s10   ;;  %s524_s9 = sphi %s572_s9, %s703_s9  }
   0x6   : > { %p25_p0 = scmp.ge.s32.totalorder %s24_s18, 3  ;;  %s27_s19 = sadd.s32 1, %s548_s15 }
   0x7   : > { %s62_s20 = sadd.s32 1, %s532_s11  ;;  %p69_p1 = scmp.ne.s32.totalorder %s532_s11, %s528_s10 }
   0x8   : > { %s711_s18 = smov (%p25_p0, %s24_s18), 0  ;;  %s713_s19 = smov (!%p25_p0, %s27_s19), %s548_s15 }
   0x9   : > { %s58_s21 = ssub.s32 %s544_s14, %s711_s18  ;;  %p70_p2 = scmp.eq.s32.totalorder %s552_s16, 0 }
   0xa   : > { %p29_p3 = scmp.ge.s32.totalorder %s713_s19, 2  ;;  %p75_p4 = scmp.ne.s32.totalorder %s528_s10, %s524_s9 }
   0xb   : > { %p623_p5 = por %p70_p2, %p69_p1  ;;  %p76_p6 = scmp.eq.s32.totalorder %s353_s17, 0 }
   0xc   : > { %s715_s19 = smov (%p29_p3, %s713_s19), 0  ;;  %p380_p8 = scmp.lt.s32.totalorder %s552_s16, 6 }
   0xd   : > { %p629_p7 = por %p76_p6, %p75_p4  ;;  %s57_s24 = ssub.s32 %s548_s15, %s715_s19 }
   0xe   : > { %s59_s25 = sor.u32 %s58_s21, %s57_s24  ;;  %s132_s26 = sand.u32 1, %s532_s11  }
   0xf   : > { %p60_p9 = scmp.eq.s32.totalorder %s59_s25, 0  ;;  %s357_s27 = sshll.u32 %s132_s26, 3 }
  0x10   : > { %s368_s28 = smul.u32 3, %s548_s15  ;;  %s136_s4 = scalar_lea.vmem [#allocation5], %s357_s27 }
  0x11   : > { %s639_s29 = scalar_select %p60_p9, %s532_s11, %s62_s20  }
  0x12   : > { %s140_s30 = sadd.s32 %s544_s14, %s368_s28  ;;  %s146_s5 = sshll.u32 %s136_s4, 4  ;;  %s147_s5 = int_to_ptr.vmem [resolvable:$true] %s146_s5 }
  0x13   : > { %s358_s3 = sshll.u32 %s140_s30, 3  ;;  %p377_p10 = pnand %p380_p8, %p623_p5 }
  0x14   : > { %s142_s8 = scalar_lea.hbm %s699_s1, %s358_s3  ;;  %p359_p11 = scmp.ge.s32.totalorder %s552_s16, 1 }
  0x15   : > { %s144_s9 = sshll.u32 %s142_s8, 4  ;;  %p151_p12 = scmp.lt.s32.totalorder %s552_s16, 7  ;;  %s145_s9 = int_to_ptr.hbm [resolvable:$true] %s144_s9 }
  0x16   : > { %s133_s17 = scalar_lea.sflag [#allocation6], %s132_s26 }
  0x17   : > { %379 = dma.hbm_to_vmem [thread:$0]  (!%p377_p10), %s145_s9, 128, %s147_s5, %s133_s17  }
  0x18   : > { %p152_p13 = pnand %p359_p11, %p151_p12 }
  0x19   : > { %s157_s20 = sand.u32 (!%p152_p13), 1, %s528_s10  }
  0x1a   : > { %155 = sbr.rel (%p152_p13) target bundleno = 554 (0x22a), region = 28  ;;  %s360_s21 = sshll.u32 (!%p152_p13), %s157_s20, 3 }
  0x1b   : > { %s158_s24 = scalar_lea.sflag (!%p152_p13), [#allocation6], %s157_s20  ;;  %s161_s25 = scalar_lea.vmem (!%p152_p13), [#allocation5], %s360_s21 }
  0x1f   : > { %519 = dma.done.wait (%p629_p7), %s158_s24, 128  }
  0x20   : > { %521 = vsyncadd (%p629_p7), %s158_s24, 4294967168  ;;  %p186_p0 = scmp.lt.s32.totalorder %s540_s13, 1  ;;  %p363_p1 = scmp.ne.s32.totalorder %s536_s12, 0 }
  0x22   : > { %s717_s13 = smov (!%p186_p0, %s540_s13), 1  ;;  %197 = sbr.rel (%p363_p1) target bundleno = 43 (0x2b), region = 36 }
  0x23   : > { %s361_s22 = sshll.u32 %s717_s13, 3 }
  0x24   : > { %s189_s28 = scalar_lea.vmem %s698_s0, %s361_s22  ;;  %s664_s4 = scalar_lea.vmem %s700_s2, %s361_s22 }
  0x27   : > { %vm198_vm0 = vcmask 7168   ;;  %v554_v0 = vmov -inf   ;;  %v555_v1 = vmov 0.0  }
  0x28   : > { %199 = vst.msk [vmem:[#allocation2] sm:$0xff] %vm198_vm0, %v554_v0 }
  0x29   : > { %200 = vst.msk [vmem:[#allocation3] sm:$0xff] %vm198_vm0, %v555_v1 }
  0x2a   : > { %201 = vst.msk [vmem:[#allocation4] sm:$0xff] %vm198_vm0, %v555_v1 }
  0x2b PF: > { %v202_v2 = vld [vmem:[%s189_s28] sm:$0xff]  ;;  %v556_v3 = vmov 0   ;;  %vm227_vm1 = vcmask 7168   ;;  %v214_v17 = vlaneseq  ;;  %s364_s13 = sshll.u32 %s536_s12, 7  ;;  %p365_p2 = scmp.ne.s32.totalorder %s536_s12, 2 }
  0x2c   : > { %448 = vset.pattern.permute.xlu0 %v556_v3  ;;  %v203_v4 = vmul.f32 -10.5, %v202_v2  ;;  %449 = vset.pattern.permute.xlu1 %v556_v3  ;;  %v204_v5 = vld [vmem:[%s161_s25] sm:$0xff]  ;;  %v370_v11 = vceil.f32 %v202_v2  ;;  %v371_v12 = vfloor.f32 %v202_v2  ;;  %vm369_vm2 = vcmp.lt.s32.totalorder %v202_v2, 0 }
  0x2d   : > { %v205_v6 = vmul.f32 30.0, %v204_v5  ;;  %v215_v19 = vand.u32 127, %v214_v17  ;;  %v216_v20 = vstv %s364_s13 }
  0x2e   : > { %208 = vperm.xlu0 %448, %v203_v4   ;;  %v372_v15 = vsel %vm369_vm2, %v370_v11, %v371_v12 }
  0x2f   : > { %v229_v9 = vld [vmem:[#allocation2] sm:$0xff]  ;;  %v373_v16 = vcvt.f32.s32 %v372_v15  ;;  %v217_v22 = vadd.s32 %v216_v20, %v215_v19 }
  0x30   : > { %v236_v32 = vld [vmem:[#allocation3] sm:$0xff] }
  0x31   : > { %v218_v28 = vld [vmem:[#allocation4] sm:$0xff] }
  0xa0   : > { %v209_v7 = vpop.permute.xlu0 %208 }
  0xa1   : > { %v211_v8 = vadd.f32 %v209_v7, %v205_v6 }
  0xa3   : > { %230 = vmax.xlane.f32.xlu0 %v211_v8 }
 0x116   : > { %v231_v10 = vpop.xlane.xlu0 %230 }
 0x117   : > { %v232_v13 = vmax.f32 %v229_v9, %v231_v10 }
 0x119   : > { %v233_v14 = vsub.f32 %v229_v9, %v232_v13  ;;  %250 = vst.msk [vmem:[#allocation2] sm:$0xff] %vm227_vm1, %v232_v13  ;;  %240 = vperm.xlu1 %449, %v232_v13  }
 0x11b   : > { %v234_v27 = vmul.f32 1.442695, %v233_v14 }
 0x121   : > { %220 = vperm.xlu1 %449, %v373_v16  }
 0x18b   : > { %v241_v18 = vpop.permute.xlu1 %240 }
 0x18c   : > { %v243_v21 = vsub.f32 %v211_v8, %v241_v18 }
 0x18e   : > { %v244_v23 = vmul.f32 1.442695, %v243_v21 }
 0x190   : > { %450 = vpow2.f32 %v244_v23 }
 0x191   : > { %452 = vpow2.f32 %v234_v27 }
 0x193   : > { %v221_v24 = vpop.permute.xlu1 %220 }
 0x194   : > { %vm222_vm3 = vcmp.eq.s32.totalorder %v217_v22, %v221_v24 }
 0x195   : > { %v223_v25 = vsel %vm222_vm3, %v211_v8, 0.0 }
 0x196   : > { %224 = vadd.xlane.f32.xlu2 %v223_v25  ;;  %v451_v26 = vpop.eup %450 }
 0x197   : > { %v453_v31 = vpop.eup %452 }
 0x198   : > { %v237_v33 = vmul.f32 %v453_v31, %v236_v32 }
 0x19e   : > { %246 = vadd.xlane.f32.xlu2 %v451_v26 }
 0x209   : > { %v225_v29 = vpop.xlane.xlu2 %224 }
 0x20a   : > { %v226_v30 = vadd.f32 %v225_v29, %v218_v28 }
 0x20c   : > { %228 = vst.msk [vmem:[#allocation4] sm:$0xff] %vm227_vm1, %v226_v30 }
 0x210   : > { %254 = sbr.rel (%p365_p2) target bundleno = 554 (0x22a), region = 40 }
 0x211   : > { %v247_v34 = vpop.xlane.xlu2 %246 }
 0x212   : > { %v248_v35 = vadd.f32 %v247_v34, %v237_v33 }
 0x214   : > { %249 = vst.msk [vmem:[#allocation3] sm:$0xff] %vm227_vm1, %v248_v35 }
 0x215   : > { %v255_v38 = vld [vmem:[#allocation2] sm:$0xff]  ;;  %v260_v40 = vld [vmem:[#allocation4] sm:$0xff] }
 0x21b   : > { %v256_v36 = vld [vmem:[#allocation3] sm:$0xff] }
 0x21c   : > { %454 = vlog2.f32 %v256_v36 }
 0x222   : > { %v455_v37 = vpop.eup %454 }
 0x223   : > { %v258_v39 = vmul.f32 0.6931472, %v455_v37 }
 0x225   : > { %v259_v41 = vadd.f32 %v258_v39, %v255_v38 }
 0x227   : > { %v261_v42 = vsub.f32 %v259_v41, %v260_v40 }
 0x229   : > { %262 = vst.msk [vmem:[%s664_s4] sm:$0xff] %vm227_vm1, %v261_v42 }
 0x22a PF: > { %s15_s16 = sadd.s32 1, %s552_s16   ;;  %s703_s9 = smov %s528_s10 }
 0x22b   : > { %p12_p3 = scmp.ge.s32.totalorder %s15_s16, 8   ;;  %s704_s10 = smov %s532_s11 }
 0x22c   : > { %s705_s11 = smov %s639_s29  ;;  %s706_s12 = smov %s544_s14 }
 0x22d   : > { %s707_s13 = smov %s548_s15  ;;  %s708_s14 = smov %s711_s18 }
 0x22e   : > { %s709_s15 = smov %s715_s19  ;;  %14 = sbr.rel (!%p12_p3) target bundleno = 5 (0x5), region = 79 }
 0x233   :  { %282 = vsyncpa [#allocation6], 1 }
 0x234   :  { %284 = vsyncpa [#allocation6 + $0x1], 1 }

</bundles_post_ra>
